<compile_context>
chip_gen: v7x
topology: tpu7x:2x2x1
jax: 0.10.0
libtpu: 0.0.40
codegen_flags: <defaults>
</compile_context>

<pallas_src>
import jax
import jax.numpy as jnp
import numpy as np
from jax.experimental import pallas as pl
from jax.experimental.pallas import tpu as pltpu


def _two_linear_kernel(x_ref, w1_ref, w2_ref, out_ref):
    x = x_ref[...]
    w1 = w1_ref[...]
    w2 = w2_ref[...]

    # Layer 1: native-dtype operands on the MXU, f32 accumulation.
    z1 = jnp.dot(x, w1, preferred_element_type=jnp.float32)
    # sigmoid(z) = 0.5 * (1 + tanh(z/2))  -- tanh runs on the EUP slot.
    h1 = 0.5 * (jnp.tanh(0.5 * z1) + 1.0)

    # Layer 2: cast h1 back to the weight dtype so bf16 weights keep MXU rate.
    z2 = jnp.dot(h1.astype(w2_ref.dtype), w2, preferred_element_type=jnp.float32)
    h2 = 0.5 * (jnp.tanh(0.5 * z2) + 1.0)

    out_ref[...] = h2.astype(out_ref.dtype)


def _round_up(n, mult):
    return ((n + mult - 1) // mult) * mult


def _resident_weight_spec(shape):
    # Weights are constant across the grid; single-buffer them to halve their
    # resident VMEM footprint (falls back cleanly if pipeline_mode/Buffered is
    # unavailable on this jax version).
    try:
        return pl.BlockSpec(shape, lambda i: (0, 0),
                            pipeline_mode=pl.Buffered(1))
    except (TypeError, AttributeError):
        return pl.BlockSpec(shape, lambda i: (0, 0))


def two_linear_layer_forward(x, w1, w2, *, block_rows=512):
    """Fused forward of two_linear_layer: sigmoid(sigmoid(x @ W1) @ W2)."""
    m, in_size = x.shape
    assert w1.shape[0] == in_size
    out_size = w1.shape[1]
    assert w2.shape == (out_size, out_size)

    out_dtype = x.dtype
    x_item = jnp.dtype(x.dtype).itemsize
    w_item = jnp.dtype(w1.dtype).itemsize
    o_item = jnp.dtype(out_dtype).itemsize

    # --- lane-pad the feature/output axis to a multiple of 128 -------------
    out_pad = _round_up(out_size, 128)
    if out_pad != out_size:
        w1 = jnp.pad(w1, ((0, 0), (0, out_pad - out_size)))
        w2 = jnp.pad(w2, ((0, out_pad - out_size), (0, out_pad - out_size)))

    # Resident-weight design: both weight matrices live in VMEM across the
    # whole grid.
    w_resident_bytes = (in_size * out_pad + out_pad * out_pad) * w_item
    # TODO(synk): add an N-tiled / K-accumulated grid path for weights that
    # exceed the resident budget (matters most on v7x's 64 MiB VMEM per TC).
    assert w_resident_bytes <= 16 * 1024 * 1024, (
        "weights too large for the resident-weight fused kernel")

    def vmem_bytes(tm_):
        x_tile = 2 * tm_ * in_size * x_item          # double-buffered input tile
        o_tile = 2 * tm_ * out_pad * o_item          # double-buffered output tile
        tmp = 3 * tm_ * out_pad * 4                  # f32 z1 / h1 / z2 temporaries
        return x_tile + o_tile + 2 * w_resident_bytes + tmp  # weights counted conservatively

    # --- row tiling ---------------------------------------------------------
    if m <= 16:
        tm = m                                       # trivial M: single tile
    elif m <= 2 * block_rows:
        # At least 2 row tiles so "parallel" can shard across v7x's two TCs.
        tm = _round_up(max(8, -(-m // 2)), 8)
    else:
        if block_rows >= 256:
            tm = (block_rows // 256) * 256           # match 2x256x256 MXU
        else:
            tm = max(8, (block_rows // 8) * 8)
        # Shrink the tile if it would blow past ~44 MiB of VMEM (v7x budget).
        while tm > 256 and vmem_bytes(tm) > 44 * 1024 * 1024:
            tm = max(256, tm // 2)

    m_pad = _round_up(m, tm)
    x_in = x if m_pad == m else jnp.pad(x, ((0, m_pad - m), (0, 0)))
    grid = (m_pad // tm,)

    vmem_limit = int(min(48 * 1024 * 1024,
                         max(16 * 1024 * 1024,
                             vmem_bytes(tm) * 5 // 4 + (2 << 20))))

    flops = 2 * m_pad * in_size * out_pad + 2 * m_pad * out_pad * out_pad
    transcendentals = 2 * m_pad * out_pad
    bytes_accessed = (m_pad * in_size * x_item
                      + (in_size * out_pad + out_pad * out_pad) * w_item
                      + m_pad * out_pad * o_item)

    out = pl.pallas_call(
        _two_linear_kernel,
        out_shape=jax.ShapeDtypeStruct((m_pad, out_pad), out_dtype),
        grid=grid,
        in_specs=[
            pl.BlockSpec((tm, in_size), lambda i: (i, 0)),     # x row tile
            _resident_weight_spec((in_size, out_pad)),         # W1 (resident)
            _resident_weight_spec((out_pad, out_pad)),         # W2 (resident)
        ],
        out_specs=pl.BlockSpec((tm, out_pad), lambda i: (i, 0)),
        compiler_params=pltpu.CompilerParams(
            dimension_semantics=("parallel",),   # megacore sharding on v7x
            vmem_limit_bytes=vmem_limit,
        ),
        cost_estimate=pl.CostEstimate(
            flops=flops,
            transcendentals=transcendentals,
            bytes_accessed=bytes_accessed,
        ),
    )(x_in, w1, w2)

    if m_pad != m or out_pad != out_size:
        out = out[:m, :out_size]
    return out


def _reference(x, w1, w2):
    h1 = jax.nn.sigmoid(x @ w1)
    h2 = jax.nn.sigmoid(h1 @ w2)
    return h2


if __name__ == "__main__":
    key = jax.random.PRNGKey(0)
    k_x, k_w1, k_w2 = jax.random.split(key, 3)

    batch, in_size, out_size = 8, 32, 16

    # Matches the PyTorch module: weights ~ randn(in, out), input is a dense
    # 2-D embedding matrix.
    x = jax.random.normal(k_x, (batch, in_size), dtype=jnp.float32)
    w1 = jax.random.normal(k_w1, (in_size, out_size), dtype=jnp.float32)
    w2 = jax.random.normal(k_w2, (out_size, out_size), dtype=jnp.float32)

    out = two_linear_layer_forward(x, w1, w2)
    jax.block_until_ready(out)

    assert out.shape == (batch, out_size)
    assert out.dtype == x.dtype
    ref = _reference(x, w1, w2)
    np.testing.assert_allclose(np.asarray(out), np.asarray(ref),
                               rtol=1e-4, atol=2e-5)
    print("KERNEL_OK")
</pallas_src>

<mosaic_0001>
module attributes {stable_mosaic.version = 11 : i64} {
  func.func @_two_linear_kernel(%arg0: i32, %arg1: memref<8x32xf32, #tpu.memory_space<vmem>>, %arg2: memref<32x128xf32, #tpu.memory_space<vmem>>, %arg3: memref<128x128xf32, #tpu.memory_space<vmem>>, %arg4: memref<8x128xf32, #tpu.memory_space<vmem>>) attributes {dimension_semantics = [#tpu.dimension_semantics<parallel>], iteration_bounds = array<i64: 1>, scalar_prefetch = 0 : i64, scratch_operands = 0 : i64, tpu.core_type = #tpu.core_type<tc>, window_params = [{transform_indices = @transform_0, window_bounds = array<i64: 8, 32>}, {pipeline_mode = #tpu.pipeline_mode<synchronous>, transform_indices = @transform_1, window_bounds = array<i64: 32, 128>}, {pipeline_mode = #tpu.pipeline_mode<synchronous>, transform_indices = @transform_2, window_bounds = array<i64: 128, 128>}, {transform_indices = @transform_3, window_bounds = array<i64: 8, 128>}]} {
    %c0 = arith.constant 0 : index
    %c0_0 = arith.constant 0 : index
    %0 = vector.load %arg1[%c0, %c0_0] : memref<8x32xf32, #tpu.memory_space<vmem>>, vector<8x32xf32>
    %c0_1 = arith.constant 0 : index
    %c0_2 = arith.constant 0 : index
    %1 = vector.load %arg2[%c0_1, %c0_2] : memref<32x128xf32, #tpu.memory_space<vmem>>, vector<32x128xf32>
    %c0_3 = arith.constant 0 : index
    %c0_4 = arith.constant 0 : index
    %2 = vector.load %arg3[%c0_3, %c0_4] : memref<128x128xf32, #tpu.memory_space<vmem>>, vector<128x128xf32>
    %cst = arith.constant dense<0.000000e+00> : vector<8x128xf32>
    %3 = tpu.matmul %0, %1, %cst {dimension_numbers = #tpu.dot_dimension_numbers<[1], [0], [0], [1], [0, 0, 1, 1], [], []>} : vector<8x32xf32>, vector<32x128xf32>, vector<8x128xf32> -> vector<8x128xf32>
    %cst_5 = arith.constant 5.000000e-01 : f32
    %4 = vector.broadcast %cst_5 : f32 to vector<8x128xf32>
    %5 = arith.mulf %4, %3 : vector<8x128xf32>
    %6 = math.tanh %5 : vector<8x128xf32>
    %cst_6 = arith.constant 1.000000e+00 : f32
    %7 = vector.broadcast %cst_6 : f32 to vector<8x128xf32>
    %8 = arith.addf %6, %7 : vector<8x128xf32>
    %cst_7 = arith.constant 5.000000e-01 : f32
    %9 = vector.broadcast %cst_7 : f32 to vector<8x128xf32>
    %10 = arith.mulf %9, %8 : vector<8x128xf32>
    %cst_8 = arith.constant dense<0.000000e+00> : vector<8x128xf32>
    %11 = tpu.matmul %10, %2, %cst_8 {dimension_numbers = #tpu.dot_dimension_numbers<[1], [0], [0], [1], [0, 0, 1, 1], [], []>} : vector<8x128xf32>, vector<128x128xf32>, vector<8x128xf32> -> vector<8x128xf32>
    %cst_9 = arith.constant 5.000000e-01 : f32
    %12 = vector.broadcast %cst_9 : f32 to vector<8x128xf32>
    %13 = arith.mulf %12, %11 : vector<8x128xf32>
    %14 = math.tanh %13 : vector<8x128xf32>
    %cst_10 = arith.constant 1.000000e+00 : f32
    %15 = vector.broadcast %cst_10 : f32 to vector<8x128xf32>
    %16 = arith.addf %14, %15 : vector<8x128xf32>
    %cst_11 = arith.constant 5.000000e-01 : f32
    %17 = vector.broadcast %cst_11 : f32 to vector<8x128xf32>
    %18 = arith.mulf %17, %16 : vector<8x128xf32>
    %c0_12 = arith.constant 0 : index
    %c0_13 = arith.constant 0 : index
    %19 = vector.load %arg4[%c0_12, %c0_13] : memref<8x128xf32, #tpu.memory_space<vmem>>, vector<8x128xf32>
    tpu.vector_store %arg4[%c0_12, %c0_13], %18 {strides = array<i32>} : memref<8x128xf32, #tpu.memory_space<vmem>>, vector<8x128xf32>,
    return
  }
  func.func @transform_0(%arg0: i32) -> (i32, i32) {
    %c0_i32 = arith.constant 0 : i32
    %c0_i32_0 = arith.constant 0 : i32
    return %arg0, %c0_i32 : i32, i32
  }
  func.func @transform_1(%arg0: i32) -> (i32, i32) {
    %c0_i32 = arith.constant 0 : i32
    %c0_i32_0 = arith.constant 0 : i32
    %c0_i32_1 = arith.constant 0 : i32
    return %c0_i32, %c0_i32_0 : i32, i32
  }
  func.func @transform_2(%arg0: i32) -> (i32, i32) {
    %c0_i32 = arith.constant 0 : i32
    %c0_i32_0 = arith.constant 0 : i32
    %c0_i32_1 = arith.constant 0 : i32
    return %c0_i32, %c0_i32_0 : i32, i32
  }
  func.func @transform_3(%arg0: i32) -> (i32, i32) {
    %c0_i32 = arith.constant 0 : i32
    %c0_i32_0 = arith.constant 0 : i32
    return %arg0, %c0_i32 : i32, i32
  }
}

</mosaic_0001>

<bundles_post_ra>
// kernel: tpu_custom_call.1
= control target key start
LH: loop header
LB: loop body
LE: loop exit
PB: predicated region body
PF: predicated region fallthrough
CT: control target
= control target key end

     0   :  { %8 = vsyncpa [#allocation3], 0  ;;  %s533_s0 = inlined_call_operand.hbm [shape: f32[8,32], index: 0, kind: input, shape index: {}]   ;;  %s534_s1 = inlined_call_operand.hbm [shape: f32[32,128], index: 1, kind: input, shape index: {}]   ;;  %s535_s2 = inlined_call_operand.hbm [shape: f32[128,128], index: 2, kind: input, shape index: {}]   ;;  %s536_s3 = inlined_call_operand.hbm [shape: f32[8,128], index: 3, kind: output, shape index: {}]  }
   0x1   :  { %9 = vsyncpa [#allocation6], 0 }
   0x2   :  { %10 = vsyncpa [#allocation4], 0  ;;  %s450_s12 = smov [#allocation5]   ;;  %s356_s16 = scalar_lea.hbm %s534_s1, 512 }
   0x3   :  { %s26_s13 = sshll.u32 %s450_s12, 4  ;;  %p357_p0 = scmp.ne.s32.totalorder %s534_s1, %s356_s16  ;;  %s27_s13 = int_to_ptr.vmem [resolvable:$true] %s26_s13 }
   0x4   :  { %p360_p1 = scmp.lt.u32.totalorder %s356_s16, %s534_s1 }
   0x6   :  { %p362_p2 = pnand %p360_p1, %p357_p0 }
   0x8   :  { %365 = shalt.err (!%p362_p2)
}
   0x9   :  { %s366_s21 = scalar_lea.vmem %s27_s13, 512  ;;  %p371_p4 = scmp.lt.s32.totalorder %s27_s13, %s27_s13 }
   0xa   :  { %p367_p3 = scmp.ne.s32.totalorder %s27_s13, %s366_s21  ;;  %p372_p5 = scmp.lt.s32.totalorder %s366_s21, %s366_s21 }
   0xc   :  { %p373_p6 = por %p372_p5, %p371_p4 }
   0xe   :  { %p374_p7 = pnand %p373_p6, %p367_p3 }
  0x10   :  { %377 = shalt.err (!%p374_p7)
}
  0x11   :  { %s451_s22 = smov 128   ;;  %s452_s23 = smov 8  }
  0x12   :  { %32 = dma.hbm_to_vmem [thread:$0]  %s534_s1, 512, %s27_s13, [#allocation6], %s451_s22, %s451_s22, %s452_s23  }
  0x13   :  { %s453_s26 = smov [#allocation2]   ;;  %s454_s28 = smov [#allocation7]  }
  0x14   :  { %s17_s27 = sshll.u32 %s453_s26, 4  ;;  %s38_s29 = sshll.u32 %s454_s28, 4  ;;  %s18_s27 = int_to_ptr.vmem [resolvable:$true] %s17_s27  ;;  %s39_s29 = int_to_ptr.vmem [resolvable:$true] %s38_s29 }
  0x15   :  { %s378_s5 = scalar_lea.hbm %s533_s0, 128 }
  0x16   :  { %p379_p8 = scmp.ne.s32.totalorder %s533_s0, %s378_s5  ;;  %p382_p9 = scmp.lt.u32.totalorder %s378_s5, %s533_s0 }
  0x18   :  { %p384_p10 = pnand %p382_p9, %p379_p8 }
  0x1a   :  { %387 = shalt.err (!%p384_p10)
}
  0x1b   :  { %s388_s1 = scalar_lea.vmem %s18_s27, 128  ;;  %p393_p12 = scmp.lt.s32.totalorder %s18_s27, %s18_s27 }
  0x1c   :  { %p389_p11 = scmp.ne.s32.totalorder %s18_s27, %s388_s1  ;;  %p394_p13 = scmp.lt.s32.totalorder %s388_s1, %s388_s1 }
  0x1e   :  { %p395_p0 = por %p394_p13, %p393_p12 }
  0x20   :  { %p396_p1 = pnand %p395_p0, %p389_p11 }
  0x22   :  { %399 = shalt.err (!%p396_p1)
}
  0x23   :  { %20 = dma.hbm_to_vmem [thread:$0]  %s533_s0, 128, %s18_s27, [#allocation3]  }
  0x24   :  { %s400_s14 = scalar_lea.hbm %s535_s2, 2048 }
  0x25   :  { %p401_p2 = scmp.ne.s32.totalorder %s535_s2, %s400_s14  ;;  %p404_p3 = scmp.lt.u32.totalorder %s400_s14, %s535_s2 }
  0x27   :  { %p406_p4 = pnand %p404_p3, %p401_p2 }
  0x29   :  { %409 = shalt.err (!%p406_p4)
}
  0x2a   :  { %s410_s19 = scalar_lea.vmem %s39_s29, 2048  ;;  %p415_p6 = scmp.lt.s32.totalorder %s39_s29, %s39_s29 }
  0x2b   :  { %p411_p5 = scmp.ne.s32.totalorder %s39_s29, %s410_s19  ;;  %p416_p7 = scmp.lt.s32.totalorder %s410_s19, %s410_s19 }
  0x2d   :  { %p417_p8 = por %p416_p7, %p415_p6 }
  0x2f   :  { %p418_p9 = pnand %p417_p8, %p411_p5 }
  0x31   :  { %421 = shalt.err (!%p418_p9)
}
  0x32   :  { %44 = dma.hbm_to_vmem [thread:$0]  %s535_s2, 2048, %s39_s29, [#allocation6], %s451_s22, %s451_s22, %s452_s23  }
  0x33   :  { %444 = dma.done.wait [#allocation3], 128  }
  0x34   :  { %445 = vsyncadd [#allocation3], 4294967168 }
  0x35   :  { %446 = dma.done.wait [#allocation6], 2560  }
  0x36   :  { %447 = vsyncadd [#allocation6], 4294964736  ;;  %v455_v0 = vmov 0.0|0.0   ;;  %vm456_vm0 = vmmov 0   ;;  %v457_v1 = vmov 0.0   ;;  %v55_v2 = vld [vmem:[#allocation5] sm:$0xff] }
  0x37   :  { %313 = vmatprep.subr.bf16.mxu0 %v455_v0  ;;  %275 = vmatprep.mubr.msk.f32.mxu0 %vm456_vm0, %v457_v1  ;;  %v56_v3 = vld [vmem:[#allocation5 + $0x8] sm:$0xff]  ;;  %v57_v4 = vld [vmem:[#allocation5 + $0x10] sm:$0xff]  ;;  %v58_v6 = vld [vmem:[#allocation5 + $0x18] sm:$0xff]  ;;  %vm75_vm1 = vcmask 261120   ;;  %s458_s2 = smov [#allocation8]  }
  0x38   :  { %319 = vmatprep.subr.bf16.mxu1 %v455_v0  ;;  %310 = vmatprep.mubr.msk.f32.mxu1 %vm456_vm0, %v457_v1  ;;  %v314_v5 = vpack.c.bf16 %v56_v3, %v55_v2  ;;  %v59_v7 = vld [vmem:[#allocation7] sm:$0xff]  ;;  %v60_v8 = vld [vmem:[#allocation7 + $0x8] sm:$0xff]  ;;  %v61_v9 = vld [vmem:[#allocation7 + $0x10] sm:$0xff]  ;;  %v317_v11 = vpack.c.bf16 %v58_v6, %v57_v4  ;;  %s234_s21 = sshll.u32 %s458_s2, 4  ;;  %s235_s21 = int_to_ptr.vmem [resolvable:$true] %s234_s21 }
  0x39   :  { %v62_v10 = vld [vmem:[#allocation7 + $0x18] sm:$0xff]  ;;  %v320_v12 = vpack.c.bf16 %v60_v8, %v59_v7  ;;  %v63_v14 = vld [vmem:[#allocation7 + $0x20] sm:$0xff]  ;;  %v64_v15 = vld [vmem:[#allocation7 + $0x28] sm:$0xff]  ;;  %s422_s22 = scalar_lea.vmem %s235_s21, 128  ;;  %p427_p11 = scmp.lt.s32.totalorder %s235_s21, %s235_s21 }
  0x3a   :  { %315 = vmatpush3.bf16.msra.mxu0 %v314_v5  ;;  %v323_v13 = vpack.c.bf16 %v62_v10, %v61_v9  ;;  %v54_v16 = vld [vmem:[#allocation2] sm:$0xff]  ;;  %v326_v17 = vpack.c.bf16 %v64_v15, %v63_v14  ;;  %v65_v18 = vld [vmem:[#allocation7 + $0x30] sm:$0xff]  ;;  %v67_v21 = vld [vmem:[#allocation7 + $0x40] sm:$0xff]  ;;  %p423_p10 = scmp.ne.s32.totalorder %s235_s21, %s422_s22  ;;  %p428_p12 = scmp.lt.s32.totalorder %s422_s22, %s422_s22 }
  0x3b   :  { %316 = vmatprep.subr.bf16.mxu0 %v455_v0  ;;  %321 = vmatpush3.bf16.msra.mxu1 %v320_v12  ;;  %v66_v19 = vld [vmem:[#allocation7 + $0x38] sm:$0xff]  ;;  %v68_v22 = vld [vmem:[#allocation7 + $0x48] sm:$0xff]  ;;  %v69_v24 = vld [vmem:[#allocation7 + $0x50] sm:$0xff] }
  0x3c   :  { %322 = vmatprep.subr.bf16.mxu1 %v455_v0  ;;  %v329_v20 = vpack.c.bf16 %v66_v19, %v65_v18  ;;  %v332_v23 = vpack.c.bf16 %v68_v22, %v67_v21  ;;  %v70_v25 = vld [vmem:[#allocation7 + $0x58] sm:$0xff]  ;;  %v71_v27 = vld [vmem:[#allocation7 + $0x60] sm:$0xff]  ;;  %v72_v28 = vld [vmem:[#allocation7 + $0x68] sm:$0xff]  ;;  %p429_p13 = por %p428_p12, %p427_p11 }
  0x3d   :  { %v335_v26 = vpack.c.bf16 %v70_v25, %v69_v24  ;;  %v338_v29 = vpack.c.bf16 %v72_v28, %v71_v27  ;;  %v73_v30 = vld [vmem:[#allocation7 + $0x70] sm:$0xff]  ;;  %v74_v31 = vld [vmem:[#allocation7 + $0x78] sm:$0xff] }
  0x3e   :  { %318 = vmatpush3.bf16.msra.mxu0 %v317_v11  ;;  %v341_v32 = vpack.c.bf16 %v74_v31, %v73_v30  ;;  %p430_p0 = pnand %p429_p13, %p423_p10 }
  0x3f   :  { %324 = vmatpush3.bf16.msra.mxu1 %v323_v13 }
  0x40   :  { %325 = vmatprep.subr.bf16.mxu1 %v455_v0 }
  0x41   :  { %276 = vmatmul.mubr.msk.f32.vlgmr.msra.gmra.mrb[0].mxu0 %vm75_vm1, %v54_v16 }
  0x43   :  { %327 = vmatpush3.bf16.msra.mxu1 %v326_v17 }
  0x44   :  { %328 = vmatprep.subr.bf16.mxu1 %v455_v0 }
  0x47   :  { %330 = vmatpush3.bf16.msra.mxu1 %v329_v20 }
  0x48   :  { %331 = vmatprep.subr.bf16.mxu1 %v455_v0 }
  0x4b   :  { %333 = vmatpush3.bf16.msra.mxu1 %v332_v23 }
  0x4c   :  { %334 = vmatprep.subr.bf16.mxu1 %v455_v0 }
  0x4f   :  { %336 = vmatpush3.bf16.msra.mxu1 %v335_v26 }
  0x50   :  { %337 = vmatprep.subr.bf16.mxu1 %v455_v0 }
  0x53   :  { %339 = vmatpush3.bf16.msra.mxu1 %v338_v29 }
  0x54   :  { %340 = vmatprep.subr.bf16.mxu1 %v455_v0 }
  0x57   :  { %342 = vmatpush3.bf16.msra.mxu1 %v341_v32 }
 0x114   :  { %v145_v33 = vpop.f32.mrb[0].mxu0 }
 0x115   :  { %v149_v34 = vmul.f32 0.5, %v145_v33  ;;  %v277_v35 = vpop.f32.mrb[1].mxu0 }
 0x117   :  { %352 = vtanh.f32 %v149_v34 }
 0x121   :  { %v353_v36 = vpop.eup %352 }
 0x122   :  { %v151_v37 = vadd.f32 1.0, %v353_v36 }
 0x124   :  { %v152_v38 = vmul.f32 0.5, %v151_v37 }
 0x126   :  { %311 = vmatmul.mubr.f32.vlgmr.msra.gmra.mrb[0].mxu1 %v152_v38 }
 0x1f9   :  { %v219_v39 = vpop.f32.mrb[0].mxu1 }
 0x1fa   :  { %v223_v40 = vmul.f32 0.5, %v219_v39  ;;  %v312_v41 = vpop.f32.mrb[1].mxu1 }
 0x1fc   :  { %354 = vtanh.f32 %v223_v40 }
 0x206   :  { %v355_v42 = vpop.eup %354 }
 0x207   :  { %v225_v43 = vadd.f32 1.0, %v355_v42 }
 0x209   :  { %v226_v44 = vmul.f32 0.5, %v225_v43 }
 0x20b   :  { %227 = vst [vmem:[#allocation8] sm:$0xff] %v226_v44 }
 0x20c   :  { %433 = shalt.err (!%p430_p0)
}
 0x20d   :  { %s434_s25 = scalar_lea.hbm %s536_s3, 128 }
 0x20e   :  { %p435_p1 = scmp.ne.s32.totalorder %s536_s3, %s434_s25  ;;  %p438_p2 = scmp.lt.u32.totalorder %s434_s25, %s536_s3 }
 0x210   :  { %p440_p3 = pnand %p438_p2, %p435_p1 }
 0x212   :  { %443 = shalt.err (!%p440_p3)
}
 0x213   :  { %237 = dma.vmem_to_hbm [thread:$0]  %s235_s21, 128, %s536_s3, [#allocation4]  }
 0x214   :  { %448 = dma.done.wait [#allocation4], 128  }
 0x215   :  { %449 = vsyncadd [#allocation4], 4294967168 }
 0x216   :  { %241 = vsyncpa [#allocation3], 1 }
 0x217   :  { %242 = vsyncpa [#allocation6], 1 }
 0x218   :  { %243 = vsyncpa [#allocation4], 1 }

</bundles_post_ra>
